<compile_context>
chip_gen: v7x
topology: tpu7x:2x2x1
jax: 0.10.0
libtpu: 0.0.40
codegen_flags: <defaults>
</compile_context>

<pallas_src>
import functools
import math

import jax
import jax.numpy as jnp
from jax.experimental import pallas as pl
from jax.experimental.pallas import tpu as pltpu


def _round_up(x, m):
    return ((x + m - 1) // m) * m


_MM_COMPILER_PARAMS = pltpu.CompilerParams(
    dimension_semantics=("parallel", "parallel", "arbitrary"),
    vmem_limit_bytes=32 * 1024 * 1024,   # safe headroom on v7x's 64 MiB VMEM
)


# ----------------------------------------------------------------------------
# Pallas kernel 1: tiled matmul with fused bias add + optional ReLU
# ----------------------------------------------------------------------------
def _matmul_single_k_kernel(a_ref, b_ref, bias_ref, o_ref, *, activation):
    # Whole reduction dim in one block: no accumulator scratch / K loop.
    out = jnp.dot(a_ref[...], b_ref[...], preferred_element_type=jnp.float32)
    out = out + bias_ref[...]
    if activation == "relu":
        out = jnp.maximum(out, 0.0)
    o_ref[...] = out.astype(o_ref.dtype)


def _matmul_multi_k_kernel(a_ref, b_ref, bias_ref, o_ref, acc_ref, *, activation):
    k = pl.program_id(2)

    @pl.when(k == 0)
    def _():
        acc_ref[...] = jnp.zeros_like(acc_ref)

    acc_ref[...] += jnp.dot(a_ref[...], b_ref[...],
                            preferred_element_type=jnp.float32)

    @pl.when(k == pl.num_programs(2) - 1)
    def _():
        out = acc_ref[...] + bias_ref[...]
        if activation == "relu":
            out = jnp.maximum(out, 0.0)
        o_ref[...] = out.astype(o_ref.dtype)


def matmul_bias_act(a, layer, *, activation, out_dtype):
    """out = act(a @ W + b).  W/b are pre-padded, pre-cast bf16/f32 in `layer`."""
    M, K = a.shape
    w_p, bias_p = layer["w"], layer["b"]
    Kp, Np = w_p.shape
    tn, tk = layer["tn"], layer["tk"]
    assert K <= Kp and Kp % tk == 0 and Np % tn == 0

    tm = min(128, _round_up(max(M, 1), 16))   # bf16 sublane multiple; tm=16 for M=2
    Mp = _round_up(M, tm)

    a_p = a.astype(jnp.bfloat16)
    if (Mp, Kp) != (M, K):
        a_p = jnp.pad(a_p, ((0, Mp - M), (0, Kp - K)))

    n_k = Kp // tk
    grid = (Mp // tm, Np // tn, n_k)

    in_specs = [
        pl.BlockSpec((tm, tk), lambda i, j, k: (i, k)),
        pl.BlockSpec((tk, tn), lambda i, j, k: (k, j)),
        pl.BlockSpec((1, tn), lambda i, j, k: (0, j)),
    ]
    out_spec = pl.BlockSpec((tm, tn), lambda i, j, k: (i, j))

    if n_k == 1:
        kernel = functools.partial(_matmul_single_k_kernel, activation=activation)
        scratch = []
    else:
        kernel = functools.partial(_matmul_multi_k_kernel, activation=activation)
        scratch = [pltpu.VMEM((tm, tn), jnp.float32)]

    out = pl.pallas_call(
        kernel,
        out_shape=jax.ShapeDtypeStruct((Mp, Np), out_dtype),
        grid_spec=pltpu.PrefetchScalarGridSpec(
            num_scalar_prefetch=0,
            grid=grid,
            in_specs=in_specs,
            out_specs=out_spec,
            scratch_shapes=scratch,
        ),
        compiler_params=_MM_COMPILER_PARAMS,
    )(a_p, w_p, bias_p)
    return out[:M, :layer["n_out"]]


# ----------------------------------------------------------------------------
# Pallas kernel 2: max-reduction over pooling windows (single XLU reduce)
# ----------------------------------------------------------------------------
def _maxpool_kernel(x_ref, o_ref):
    m = jnp.max(x_ref[...].astype(jnp.float32), axis=1)
    o_ref[...] = m.astype(o_ref.dtype)


def maxpool_reduce(patches):
    """patches: (M, P, C) -> (M, C) max over window axis P."""
    M, P, C = patches.shape
    Cp = _round_up(C, 128)
    Mp = _round_up(M, 16)
    if Mp <= 512:
        tm = Mp                       # one big block, one grid step
    else:
        tm = 128
        Mp = _round_up(M, tm)
    x = jnp.pad(patches, ((0, Mp - M), (0, 0), (0, Cp - C)))
    out = pl.pallas_call(
        _maxpool_kernel,
        out_shape=jax.ShapeDtypeStruct((Mp, Cp), patches.dtype),
        grid_spec=pltpu.PrefetchScalarGridSpec(
            num_scalar_prefetch=0,
            grid=(Mp // tm,),
            in_specs=[pl.BlockSpec((tm, P, Cp), lambda i: (i, 0, 0))],
            out_specs=pl.BlockSpec((tm, Cp), lambda i: (i, 0)),
        ),
        compiler_params=pltpu.CompilerParams(
            dimension_semantics=("parallel",)),
    )(x)
    return out[:M, :C]


# ----------------------------------------------------------------------------
# JAX glue: im2col, conv / pool / linear wrappers, adaptive avg pool
# ----------------------------------------------------------------------------
# TODO(synk): im2col + stack is plain-JAX glue; a gather-style Pallas kernel
# reading NHWC directly would avoid the kh*kw activation blow-up (activations
# are tiny here, so the absolute win is small).
def _extract_patches(x_nhwc, kh, kw, stride, pad):
    if pad > 0:
        x_nhwc = jnp.pad(x_nhwc, ((0, 0), (pad, pad), (pad, pad), (0, 0)))
    B, H, W, C = x_nhwc.shape
    Ho = (H - kh) // stride + 1
    Wo = (W - kw) // stride + 1
    cols = []
    for i in range(kh):
        for j in range(kw):
            cols.append(x_nhwc[:, i:i + stride * (Ho - 1) + 1:stride,
                                  j:j + stride * (Wo - 1) + 1:stride, :])
    patches = jnp.stack(cols, axis=3)  # (B, Ho, Wo, kh*kw, C)
    return patches, Ho, Wo


def conv2d(x_nhwc, layer, *, stride, pad, relu, out_dtype=jnp.bfloat16):
    kh, kw = layer["kh"], layer["kw"]
    B, _, _, C = x_nhwc.shape
    patches, Ho, Wo = _extract_patches(x_nhwc, kh, kw, stride, pad)
    a = patches.reshape(B * Ho * Wo, kh * kw * C)
    out = matmul_bias_act(a, layer, activation="relu" if relu else "none",
                          out_dtype=out_dtype)
    return out.reshape(B, Ho, Wo, layer["n_out"])


def maxpool2d(x_nhwc, k=3, stride=2):
    B, H, W, C = x_nhwc.shape
    patches, Ho, Wo = _extract_patches(x_nhwc, k, k, stride, 0)
    out = maxpool_reduce(patches.reshape(B * Ho * Wo, k * k, C))
    return out.reshape(B, Ho, Wo, C)


def adaptive_avg_pool2d(x_nhwc, out_h, out_w):
    # PyTorch AdaptiveAvgPool2d bin semantics (tiny spatial extents -> glue).
    B, H, W, C = x_nhwc.shape
    rows = []
    for oh in range(out_h):
        h0, h1 = (oh * H) // out_h, -((-(oh + 1) * H) // out_h)
        cols = []
        for ow in range(out_w):
            w0, w1 = (ow * W) // out_w, -((-(ow + 1) * W) // out_w)
            cols.append(jnp.mean(x_nhwc[:, h0:h1, w0:w1, :], axis=(1, 2)))
        rows.append(jnp.stack(cols, axis=1))
    return jnp.stack(rows, axis=1)  # (B, out_h, out_w, C)


def linear(x, layer, *, relu, out_dtype):
    return matmul_bias_act(x, layer, activation="relu" if relu else "none",
                           out_dtype=out_dtype)


# ----------------------------------------------------------------------------
# Parameter construction (deterministic, synthetic) + one-time preparation
# ----------------------------------------------------------------------------
def init_params(key):
    def conv_p(key, out_c, in_c, kh, kw):
        k1, k2 = jax.random.split(key)
        fan_in = in_c * kh * kw
        w = jax.random.normal(k1, (kh, kw, in_c, out_c), jnp.float32)
        w = w * (1.0 / math.sqrt(fan_in))
        b = 0.01 * jax.random.normal(k2, (out_c,), jnp.float32)
        return w, b

    def lin_p(key, out_f, in_f):
        k1, k2 = jax.random.split(key)
        w = jax.random.normal(k1, (out_f, in_f), jnp.float32) / math.sqrt(in_f)
        b = 0.01 * jax.random.normal(k2, (out_f,), jnp.float32)
        return w, b

    ks = jax.random.split(key, 8)
    p = {}
    p["conv1"] = conv_p(ks[0], 64, 3, 11, 11)
    p["conv2"] = conv_p(ks[1], 192, 64, 5, 5)
    p["conv3"] = conv_p(ks[2], 384, 192, 3, 3)
    p["conv4"] = conv_p(ks[3], 256, 384, 3, 3)
    p["conv5"] = conv_p(ks[4], 256, 256, 3, 3)
    p["fc1"] = lin_p(ks[5], 4096, 256 * 6 * 6)
    p["fc2"] = lin_p(ks[6], 4096, 4096)
    p["fc3"] = lin_p(ks[7], 9, 4096)
    return p


def _prep_gemm(w_kn, bias, *, tn, tk):
    """Pad to tile multiples and cast once: weight -> bf16, bias -> f32 (1, Np)."""
    K, N = w_kn.shape
    Kp = _round_up(K, tk)
    Np = _round_up(N, tn)
    w_p = jnp.pad(w_kn.astype(jnp.bfloat16), ((0, Kp - K), (0, Np - N)))
    b_p = jnp.pad(bias.astype(jnp.float32), (0, Np - N)).reshape(1, Np)
    return {"w": w_p, "b": b_p, "n_out": N, "tn": tn, "tk": tk}


def prepare_params(raw):
    """One-time weight prep (outside the forward): reshape/transpose, pad, bf16."""
    prep = {}
    for name in ("conv1", "conv2", "conv3", "conv4", "conv5"):
        w, b = raw[name]                       # (kh, kw, in_c, out_c)
        kh, kw, in_c, out_c = w.shape
        K = kh * kw * in_c
        layer = _prep_gemm(
            w.reshape(K, out_c), b,
            tn=min(256, _round_up(out_c, 128)),
            tk=_round_up(K, 128),              # single K step for convs
        )
        layer.update(kh=kh, kw=kw)
        prep[name] = layer

    # FC: pre-transpose PyTorch (out, in) -> (in, out) once; few large K steps.
    fc_tiles = {"fc1": (512, 2304),            # K=9216 -> 4 K steps, 8 N blocks
                "fc2": (512, 2048),            # K=4096 -> 2 K steps, 8 N blocks
                "fc3": (128, 2048)}            # N=9 -> one lane-padded block
    for name, (tn, tk) in fc_tiles.items():
        w, b = raw[name]
        prep[name] = _prep_gemm(w.T, b, tn=tn, tk=tk)
    return prep


# ----------------------------------------------------------------------------
# Forward pass (use_stn=False, use_tanh=False -> STN branch skipped)
# ----------------------------------------------------------------------------
def alexnet_forward(params, x_nchw):
    # NCHW -> NHWC, stream activations as bf16 (f32 accumulation in kernels).
    x = jnp.transpose(x_nchw, (0, 2, 3, 1)).astype(jnp.bfloat16)

    # features
    x = conv2d(x, params["conv1"], stride=4, pad=2, relu=True)
    x = maxpool2d(x, 3, 2)
    x = conv2d(x, params["conv2"], stride=1, pad=2, relu=True)
    x = maxpool2d(x, 3, 2)
    x = conv2d(x, params["conv3"], stride=1, pad=1, relu=True)
    x = conv2d(x, params["conv4"], stride=1, pad=1, relu=True)
    x = conv2d(x, params["conv5"], stride=1, pad=1, relu=True)
    x = maxpool2d(x, 3, 2)

    # avgpool to (6, 6)
    x = adaptive_avg_pool2d(x, 6, 6)

    # flatten in PyTorch NCHW order: (B, C*6*6)
    x = jnp.transpose(x, (0, 3, 1, 2)).reshape(x.shape[0], 256 * 6 * 6)

    # classifier
    # TODO(synk): Dropout(0.7) layers are inference-mode identities here.
    x = linear(x, params["fc1"], relu=True, out_dtype=jnp.bfloat16)
    x = linear(x, params["fc2"], relu=True, out_dtype=jnp.bfloat16)
    x = linear(x, params["fc3"], relu=False, out_dtype=jnp.float32)
    return x


if __name__ == "__main__":
    key = jax.random.PRNGKey(0)
    pkey, xkey = jax.random.split(key)
    raw_params = init_params(pkey)
    params = prepare_params(raw_params)   # transpose/pad/bf16 weights ONCE

    # Small input consistent with the module: spatial 64x64 survives the
    # conv/pool stack (15 -> 7 -> 3 -> 1), then adaptive-pooled to 6x6.
    x = jax.random.normal(xkey, (2, 3, 64, 64), jnp.float32)

    out = alexnet_forward(params, x)
    out = jax.block_until_ready(out)
    assert out.shape == (2, 9) and out.dtype == jnp.float32
    assert bool(jnp.all(jnp.isfinite(out)))
    print("KERNEL_OK")
</pallas_src>

<mosaic_0001>
module attributes {stable_mosaic.version = 11 : i64} {
  func.func @_matmul_single_k_kernel(%arg0: i32, %arg1: i32, %arg2: i32, %arg3: memref<128x384xbf16, #tpu.memory_space<vmem>>, %arg4: memref<384x128xbf16, #tpu.memory_space<vmem>>, %arg5: memref<1x128xf32, #tpu.memory_space<vmem>>, %arg6: memref<128x128xbf16, #tpu.memory_space<vmem>>) attributes {dimension_semantics = [#tpu.dimension_semantics<parallel>, #tpu.dimension_semantics<parallel>, #tpu.dimension_semantics<arbitrary>], iteration_bounds = array<i64: 4, 1, 1>, scalar_prefetch = 0 : i64, scratch_operands = 0 : i64, tpu.core_type = #tpu.core_type<tc>, window_params = [{transform_indices = @transform_0, window_bounds = array<i64: 128, 384>}, {transform_indices = @transform_1, window_bounds = array<i64: 384, 128>}, {transform_indices = @transform_2, window_bounds = array<i64: 1, 128>}, {transform_indices = @transform_3, window_bounds = array<i64: 128, 128>}]} {
    %c0 = arith.constant 0 : index
    %c0_0 = arith.constant 0 : index
    %0 = vector.load %arg3[%c0, %c0_0] : memref<128x384xbf16, #tpu.memory_space<vmem>>, vector<128x384xbf16>
    %c0_1 = arith.constant 0 : index
    %c0_2 = arith.constant 0 : index
    %1 = vector.load %arg4[%c0_1, %c0_2] : memref<384x128xbf16, #tpu.memory_space<vmem>>, vector<384x128xbf16>
    %cst = arith.constant dense<0.000000e+00> : vector<128x128xf32>
    %2 = tpu.matmul %0, %1, %cst {dimension_numbers = #tpu.dot_dimension_numbers<[1], [0], [0], [1], [0, 0, 1, 1], [], []>} : vector<128x384xbf16>, vector<384x128xbf16>, vector<128x128xf32> -> vector<128x128xf32>
    %c0_3 = arith.constant 0 : index
    %c0_4 = arith.constant 0 : index
    %3 = vector.load %arg5[%c0_3, %c0_4] : memref<1x128xf32, #tpu.memory_space<vmem>>, vector<1x128xf32>
    %4 = vector.broadcast %3 : vector<1x128xf32> to vector<128x128xf32>
    %5 = arith.addf %2, %4 : vector<128x128xf32>
    %cst_5 = arith.constant 0.000000e+00 : f32
    %6 = vector.broadcast %cst_5 : f32 to vector<128x128xf32>
    %7 = arith.maximumf %5, %6 : vector<128x128xf32>
    %8 = arith.truncf %7 : vector<128x128xf32> to vector<128x128xbf16>
    %c0_6 = arith.constant 0 : index
    %c0_7 = arith.constant 0 : index
    %9 = vector.load %arg6[%c0_6, %c0_7] : memref<128x128xbf16, #tpu.memory_space<vmem>>, vector<128x128xbf16>
    tpu.vector_store %arg6[%c0_6, %c0_7], %8 {strides = array<i32>} : memref<128x128xbf16, #tpu.memory_space<vmem>>, vector<128x128xbf16>,
    return
  }
  func.func @transform_0(%arg0: i32, %arg1: i32, %arg2: i32) -> (i32, i32) {
    %c0_i32 = arith.constant 0 : i32
    return %arg0, %arg2 : i32, i32
  }
  func.func @transform_1(%arg0: i32, %arg1: i32, %arg2: i32) -> (i32, i32) {
    %c0_i32 = arith.constant 0 : i32
    return %arg2, %arg1 : i32, i32
  }
  func.func @transform_2(%arg0: i32, %arg1: i32, %arg2: i32) -> (i32, i32) {
    %c0_i32 = arith.constant 0 : i32
    %c0_i32_0 = arith.constant 0 : i32
    return %c0_i32, %arg1 : i32, i32
  }
  func.func @transform_3(%arg0: i32, %arg1: i32, %arg2: i32) -> (i32, i32) {
    %c0_i32 = arith.constant 0 : i32
    return %arg0, %arg1 : i32, i32
  }
}

</mosaic_0001>

<bundles_post_ra>
// kernel: tpu_custom_call.1
= control target key start
LH: loop header
LB: loop body
LE: loop exit
PB: predicated region body
PF: predicated region fallthrough
CT: control target
= control target key end

     0   :  { %8 = vsyncpa [#allocation3], 0  ;;  %s1883_s0 = inlined_call_operand.hbm [shape: bf16[512,384], index: 0, kind: input, shape index: {}]   ;;  %s1884_s1 = inlined_call_operand.hbm [shape: bf16[384,128], index: 1, kind: input, shape index: {}]   ;;  %s1885_s2 = inlined_call_operand.vmem [shape: f32[1,128], index: 2, kind: input, shape index: {}]   ;;  %s1886_s3 = inlined_call_operand.hbm [shape: bf16[512,128], index: 3, kind: output, shape index: {}]  }
   0x1   :  { %10 = vsyncpa [#allocation3 + $0x1], 0 }
   0x2   :  { %11 = vsyncpa [#allocation6], 0 }
   0x3   :  { %12 = vsyncpa [#allocation4], 0 }
   0x4   :  { %14 = vsyncpa [#allocation4 + $0x1], 0  ;;  %s1610_s12 = smov 0   ;;  %s1612_s13 = smov 0  }
   0x5   :  { %s1614_s14 = smov 0   ;;  %s1616_s15 = smov 0  }
   0x6   :  { %s1618_s16 = smov 0   ;;  %s1620_s17 = smov 0  }
   0x7 LB: > { %s1039_s18 = sadd.s32 4294967295, %s1579_s17   ;;  %s1040_s19 = sadd.s32 4294967294, %s1579_s17   ;;  %s1579_s17 = sphi %s1620_s17, %s20_s17   ;;  %s1575_s16 = sphi %s1618_s16, %s1908_s16   ;;  %s1571_s15 = sphi %s1616_s15, %s1907_s15   ;;  %s1567_s14 = sphi %s1614_s14, %s1906_s14   ;;  %s1563_s13 = sphi %s1612_s13, %s1905_s13   ;;  %s1559_s12 = sphi %s1610_s12, %s1904_s12  }
   0x8   : > { %p61_p0 = scmp.ne.s32.totalorder %s1563_s13, %s1559_s12  ;;  %p1644_p1 = scmp.eq.s32.totalorder %s1039_s18, 0 }
   0x9   : > { %p1648_p2 = scmp.eq.s32.totalorder %s1039_s18, 3  ;;  %p147_p3 = scmp.eq.s32.totalorder %s1040_s19, 3 }
   0xa   : > { %s1891_s20 = scalar_select %p1644_p1, 1, 0 }
   0xb   : > { %s1892_s21 = scalar_select %p1648_p2, 1, 0 }
   0xc   : > { %p1654_p4 = por %p1644_p1, %p61_p0  ;;  %p1041_p5 = scmp.ge.s32.totalorder %s1579_s17, 1 }
   0xd   : > { %p1659_p6 = por %p147_p3, %p61_p0  ;;  %p154_p7 = scmp.lt.s32.totalorder %s1579_s17, 5 }
   0xe   : > { %s1893_s22 = scalar_select %p1654_p4, 1, 0 }
   0xf   : > { %s1894_s23 = scalar_select %p1659_p6, 1, 0 }
  0x10   : > { %p1664_p8 = pnand %p1041_p5, %p154_p7  ;;  %s1581_s25 = smov [#allocation5]  }
  0x11   : > { %s170_s26 = sshll.u32 %s1581_s25, 4  ;;  %s39_s28 = sadd.s32 1, %s1575_s16  ;;  %s171_s26 = int_to_ptr.vmem [resolvable:$true] %s170_s26 }
  0x12   : > { %s1895_s24 = scalar_select %p1664_p8, 1, 0 }
  0x13   : > { %p1308_p9 = pneg %p1664_p8  ;;  %s1435_s4 = scalar_lea.hbm %s1884_s1, 3072 }
  0x14   : > { %p1436_p11 = scmp.ne.s32.totalorder %s1884_s1, %s1435_s4  ;;  %p1442_p3 = scmp.lt.u32.totalorder %s1435_s4, %s1884_s1 }
  0x15   : > { %p1672_p10 = pnand %p1308_p9, %p1644_p1 }
  0x17   : > { %p1437_p12 = pneg %p1672_p10 }
  0x19   : > { %p1438_p13 = pnand %p1437_p12, %p1436_p11 }
  0x1b   : > { %p1439_p0 = pneg %p1438_p13 }
  0x1d   : > { %p1444_p5 = pnand %p1442_p3, %p1439_p0 }
  0x1f   : > { %1447 = shalt.err (!%p1444_p5)
}
  0x20   : > { %s1448_s9 = scalar_lea.vmem %s171_s26, 3072  ;;  %p1456_p1 = scmp.lt.s32.totalorder %s171_s26, %s171_s26 }
  0x21   : > { %p1449_p7 = scmp.ne.s32.totalorder %s171_s26, %s1448_s9  ;;  %p1457_p4 = scmp.lt.s32.totalorder %s1448_s9, %s1448_s9 }
  0x23   : > { %p1451_p9 = pnand %p1449_p7, %p1437_p12  ;;  %p1458_p8 = por %p1457_p4, %p1456_p1 }
  0x25   : > { %p1452_p6 = pneg %p1451_p9 }
  0x27   : > { %p1459_p2 = pnand %p1458_p8, %p1452_p6 }
  0x29   : > { %1462 = shalt.err (!%p1459_p2)
}
  0x2a   : > { %s1582_s10 = smov 64   ;;  %s1583_s11 = smov 4  }
  0x2b   : > { %1311 = dma.hbm_to_vmem [thread:$0]  (!%p1672_p10), %s1884_s1, 3072, %s171_s26, [#allocation6], %s1582_s10, %s1582_s10, %s1583_s11  }
  0x2c   : > { %p41_p1 = scmp.ge.s32.totalorder %s39_s28, 4  ;;  %s48_s25 = sadd.s32 1, %s1567_s14 }
  0x2d   : > { %p55_p2 = scmp.ne.s32.totalorder %s1567_s14, %s1563_s13  ;;  %p56_p4 = scmp.eq.s32.totalorder %s1579_s17, 0 }
  0x2e   : > { %s1910_s28 = smov (%p41_p1, %s39_s28), 0  ;;  %p1897_p8 = scmp.ne.s32.totalorder %s1892_s21, 0 }
  0x2f   : > { %p57_p6 = por %p56_p4, %p55_p2  ;;  %s43_s30 = ssub.s32 %s1575_s16, %s1910_s28 }
  0x30   : > { %p1701_p11 = por %p1897_p8, %p55_p2  ;;  %p1321_p12 = scmp.lt.s32.totalorder %s1579_s17, 4 }
  0x31   : > { %p46_p13 = scmp.eq.s32.totalorder %s43_s30, 0  ;;  %s190_s27 = sand.u32 1, %s1567_s14  }
  0x32   : > { %s1297_s4 = smul.u32 192, %s190_s27  ;;  %p1713_p10 = pnand %p1321_p12, %p57_p6 }
  0x33   : > { %s1710_s5 = scalar_select %p46_p13, %s1567_s14, %s48_s25  }
  0x34   : > { %s1298_s26 = smul.u32 3072, %s1575_s16  ;;  %s194_s6 = scalar_lea.vmem [#allocation2], %s1297_s4 }
  0x35   : > { %s204_s7 = sshll.u32 %s194_s6, 4  ;;  %s1724_s11 = scalar_lea.sflag [#allocation3], %s190_s27  ;;  %s1722_s7 = int_to_ptr.vmem [resolvable:$true] %s204_s7 }
  0x36   : > { %s1720_s10 = scalar_lea.hbm %s1883_s0, %s1298_s26  ;;  %p1465_p3 = pneg %p1713_p10 }
  0x37   : > { %s1463_s18 = scalar_lea.hbm %s1720_s10, 3072  ;;  %s1468_s30 = scalar_lea.hbm %s1883_s0, 12288 }
  0x38   : > { %p1464_p0 = scmp.ne.s32.totalorder %s1720_s10, %s1463_s18  ;;  %p1469_p9 = scmp.lt.u32.totalorder %s1720_s10, %s1883_s0 }
  0x39   : > { %p1470_p1 = scmp.lt.u32.totalorder %s1468_s30, %s1463_s18  ;;  %p1472_p4 = scmp.lt.u32.totalorder %s1463_s18, %s1720_s10 }
  0x3a   : > { %p1466_p5 = pnand %p1465_p3, %p1464_p0 }
  0x3b   : > { %p1471_p2 = por %p1470_p1, %p1469_p9 }
  0x3c   : > { %p1467_p7 = pneg %p1466_p5 }
  0x3d   : > { %p1473_p6 = por %p1472_p4, %p1471_p2 }
  0x3f   : > { %p1474_p8 = pnand %p1473_p6, %p1467_p7 }
  0x41   : > { %1477 = shalt.err (!%p1474_p8)
}
  0x42   : > { %s1478_s27 = scalar_lea.vmem %s1722_s7, 3072  ;;  %s1584_s6 = smov [#allocation2]  }
  0x43   : > { %p1479_p12 = scmp.ne.s32.totalorder %s1722_s7, %s1478_s27  ;;  %s1483_s9 = sshll.u32 %s1584_s6, 4  ;;  %s1484_s9 = int_to_ptr.vmem [resolvable:$false] %s1483_s9 }
  0x44   : > { %s1485_s21 = scalar_lea.vmem %s1484_s9, 6144  ;;  %p1486_p5 = scmp.lt.s32.totalorder %s1722_s7, %s1484_s9 }
  0x45   : > { %p1481_p13 = pnand %p1479_p12, %p1465_p3  ;;  %p1487_p9 = scmp.lt.s32.totalorder %s1485_s21, %s1478_s27 }
  0x47   : > { %p1482_p0 = pneg %p1481_p13  ;;  %p1488_p1 = por %p1487_p9, %p1486_p5 }
  0x49   : > { %p1489_p2 = pnand %p1488_p1, %p1482_p0 }
  0x4b   : > { %1492 = shalt.err (!%p1489_p2)
}
  0x4c   : > { %s1585_s18 = smov 192   ;;  %s1586_s19 = smov 12  }
  0x4d   : > { %1315 = dma.hbm_to_vmem [thread:$0]  (!%p1713_p10), %s1720_s10, 3072, %s1722_s7, %s1724_s11, %s1585_s18, %s1585_s18, %s1586_s19  }
  0x4e   : > { %p1900_p3 = scmp.ne.s32.totalorder %s1895_s24, 0 }
  0x4f   : > { %s1755_s25 = sand.u32 (!%p1900_p3), 1, %s1563_s13   ;;  %p1901_p7 = scmp.ne.s32.totalorder (!%p1900_p3), %s1893_s22, 0 }
  0x50   : > { %216 = sbr.rel (%p1900_p3) target bundleno = 420 (0x1a4), region = 32  ;;  %s219_s4 = scalar_lea.sflag (!%p1900_p3), [#allocation3], %s1755_s25 }
  0x51   : > { %s1299_s30 = smul.u32 (!%p1900_p3), 192, %s1755_s25 }
  0x53   : > { %s1759_s26 = scalar_lea.vmem (!%p1900_p3), [#allocation2], %s1299_s30 }
  0x57   : > { %1546 = dma.done.wait (%p1901_p7), %s219_s4, 3072  }
  0x58   : > { %1548 = vsyncadd (%p1901_p7), %s219_s4, 4294964224  ;;  %p1902_p10 = scmp.ne.s32.totalorder %s1891_s20, 0 }
  0x5a   : > { %1550 = dma.done.wait (%p1902_p10), [#allocation6], 3072  }
  0x5b   : > { %1552 = vsyncadd (%p1902_p10), [#allocation6], 4294964224  ;;  %v1379_v0 = vld [vmem:[#allocation5 + $0x40] sm:$0xff]   ;;  %v1381_v2 = vld [vmem:[#allocation5 + $0x48] sm:$0xff]   ;;  %s1050_s24 = sshll.u32 %s1755_s25, 6  ;;  %s1137_s10 = sshll.u32 %s1571_s15, 10 }
  0x5c   : > { %v1380_v1 = vld [vmem:[#allocation5] sm:$0xff]   ;;  %1185 = vmatprep.subr.bf16.mxu0 %v1379_v0  ;;  %v1383_v4 = vld [vmem:[#allocation5 + $0x8] sm:$0xff]   ;;  %v1384_v5 = vld [vmem:[#allocation5 + $0x50] sm:$0xff]   ;;  %s1802_s7 = scalar_lea.vmem [#allocation7], %s1050_s24  ;;  %s1834_s6 = scalar_lea.hbm %s1886_s3, %s1137_s10 }
  0x5d   : > { %1186 = vmatpush3.bf16.msra.mxu0 %v1380_v1  ;;  %v1382_v3 = vld [vmem:[#allocation5 + $0x80] sm:$0xff]   ;;  %v1385_v6 = vld [vmem:[#allocation5 + $0x88] sm:$0xff]   ;;  %v1386_v7 = vld [vmem:[#allocation5 + $0x10] sm:$0xff]   ;;  %s924_s8 = sshll.u32 %s1802_s7, 4  ;;  %s910_s9 = scalar_lea.sflag [#allocation4], %s1755_s25  ;;  %s1829_s8 = int_to_ptr.vmem [resolvable:$true] %s924_s8 }
  0x5e   : > { %1187 = vmatprep.subr.bf16.mxu0 %v1381_v2  ;;  %1265 = vmatprep.subr.bf16.mxu1 %v1382_v3  ;;  %v1387_v8 = vld [vmem:[#allocation5 + $0x58] sm:$0xff]   ;;  %v1388_v9 = vld [vmem:[#allocation5 + $0x90] sm:$0xff]   ;;  %v1390_v11 = vld [vmem:[#allocation5 + $0x60] sm:$0xff]   ;;  %s1493_s21 = scalar_lea.vmem %s1829_s8, 1024  ;;  %s1587_s15 = smov [#allocation7]  }
  0x5f   : > { %1266 = vmatpush3.bf16.msra.mxu1 %v1382_v3  ;;  %v1389_v10 = vld [vmem:[#allocation5 + $0x18] sm:$0xff]   ;;  %v1392_v13 = vld [vmem:[#allocation5 + $0x20] sm:$0xff]   ;;  %v1393_v15 = vld [vmem:[#allocation5 + $0x68] sm:$0xff]   ;;  %p1494_p4 = scmp.ne.s32.totalorder %s1829_s8, %s1493_s21  ;;  %s1497_s18 = sshll.u32 %s1587_s15, 4  ;;  %s1498_s18 = int_to_ptr.vmem [resolvable:$false] %s1497_s18 }
  0x60   : > { %1267 = vmatprep.subr.bf16.mxu1 %v1385_v6  ;;  %v1391_v12 = vld [vmem:[#allocation5 + $0x98] sm:$0xff]   ;;  %v1394_v14 = vld [vmem:[#allocation5 + $0xa0] sm:$0xff]   ;;  %v1395_v16 = vld [vmem:[#allocation5 + $0x28] sm:$0xff]   ;;  %s1499_s19 = scalar_lea.vmem %s1498_s18, 2048  ;;  %p1500_p12 = scmp.lt.s32.totalorder %s1829_s8, %s1498_s18 }
  0x61   : > { %1188 = vmatpush3.bf16.msra.mxu0 %v1383_v4  ;;  %v1397_v17 = vld [vmem:[#allocation5 + $0xa8] sm:$0xff]   ;;  %v1396_v18 = vld [vmem:[#allocation5 + $0x70] sm:$0xff]   ;;  %v1399_v20 = vld [vmem:[#allocation5 + $0x78] sm:$0xff]   ;;  %p1495_p6 = pnand %p1494_p4, %p1701_p11  ;;  %p1501_p13 = scmp.lt.s32.totalorder %s1499_s19, %s1493_s21 }
  0x62   : > { %1189 = vmatprep.subr.bf16.mxu0 %v1384_v5  ;;  %v1398_v19 = vld [vmem:[#allocation5 + $0x30] sm:$0xff]   ;;  %v1401_v23 = vld [vmem:[#allocation5 + $0x38] sm:$0xff]   ;;  %v1402_v26 = vld [vmem:[%s1759_s26] ss:$12 sps:$4 sm:$0xff]  }
  0x63   : > { %1268 = vmatpush3.bf16.msra.mxu1 %v1385_v6  ;;  %v1400_v21 = vld [vmem:[#allocation5 + $0xb0] sm:$0xff]   ;;  %v1405_v25 = vld [vmem:[#allocation5 + $0xb8] sm:$0xff]   ;;  %v1407_v28 = vld [vmem:[%s1759_s26 + $0x20] ss:$12 sps:$4 sm:$0xff]   ;;  %p1496_p8 = pneg %p1495_p6  ;;  %p1502_p0 = por %p1501_p13, %p1500_p12 }
  0x64   : > { %1269 = vmatprep.subr.bf16.mxu1 %v1388_v9  ;;  %v1404_v22 = vld [vmem:[%s1759_s26 + $0x4] ss:$12 sps:$4 sm:$0xff]   ;;  %v1406_v24 = vld [vmem:[%s1759_s26 + $0x8] ss:$12 sps:$4 sm:$0xff]   ;;  %v1416_v35 = vld [vmem:[%s1759_s26 + $0x4c] ss:$12 sps:$4 sm:$0xff]  }
  0x65   : > { %1190 = vmatpush3.bf16.msra.mxu0 %v1386_v7  ;;  %651 = vmatprep.mubr.bf16.mxu0 %v1404_v22  ;;  %v1408_v27 = vld [vmem:[%s1759_s26 + $0x1c] ss:$12 sps:$4 sm:$0xff]   ;;  %v1414_v29 = vld [vmem:[%s1759_s26 + $0x38] ss:$12 sps:$4 sm:$0xff]   ;;  %v1411_v31 = vld [vmem:[%s1759_s26 + $0x34] ss:$12 sps:$4 sm:$0xff]   ;;  %p1503_p5 = pnand %p1502_p0, %p1496_p8 }
  0x66   : > { %1191 = vmatprep.subr.bf16.mxu0 %v1387_v8  ;;  %1281 = vmatprep.mubr.bf16.mxu1 %v1406_v24  ;;  %v1410_v30 = vld [vmem:[%s1759_s26 + $0x18] ss:$12 sps:$4 sm:$0xff]   ;;  %v1415_v32 = vld [vmem:[%s1759_s26 + $0x50] ss:$12 sps:$4 sm:$0xff]   ;;  %v1422_v33 = vld [vmem:[%s1759_s26 + $0x68] ss:$12 sps:$4 sm:$0xff]  }
  0x67   : > { %1270 = vmatpush3.bf16.msra.mxu1 %v1388_v9  ;;  %v1413_v34 = vld [vmem:[%s1759_s26 + $0x30] ss:$12 sps:$4 sm:$0xff]   ;;  %v1423_v36 = vld [vmem:[%s1759_s26 + $0x80] ss:$12 sps:$4 sm:$0xff]   ;;  %v1430_v37 = vld [vmem:[%s1759_s26 + $0x98] ss:$12 sps:$4 sm:$0xff]  }
  0x68   : > { %1271 = vmatprep.subr.bf16.mxu1 %v1391_v12  ;;  %v1418_v38 = vld [vmem:[%s1759_s26 + $0x48] ss:$12 sps:$4 sm:$0xff]   ;;  %v1419_v39 = vld [vmem:[%s1759_s26 + $0x64] ss:$12 sps:$4 sm:$0xff]   ;;  %v1421_v41 = vld [vmem:[%s1759_s26 + $0x60] ss:$12 sps:$4 sm:$0xff]  }
  0x69   : > { %1192 = vmatpush3.bf16.msra.mxu0 %v1389_v10  ;;  %v1431_v40 = vld [vmem:[%s1759_s26 + $0xb0] ss:$12 sps:$4 sm:$0xff]   ;;  %v1426_v43 = vld [vmem:[%s1759_s26 + $0x78] ss:$12 sps:$4 sm:$0xff]   ;;  %v1427_v44 = vld [vmem:[%s1759_s26 + $0x94] ss:$12 sps:$4 sm:$0xff]  }
  0x6a   : > { %1193 = vmatprep.subr.bf16.mxu0 %v1390_v11  ;;  %v1424_v42 = vld [vmem:[%s1759_s26 + $0x7c] ss:$12 sps:$4 sm:$0xff]   ;;  %v1432_v46 = vld [vmem:[%s1759_s26 + $0xac] ss:$12 sps:$4 sm:$0xff]   ;;  %v1796_v50 = vld [vmem:[%s1885_s2] ss:$0 sm:$0xff] }
  0x6b   : > { %1272 = vmatpush3.bf16.msra.mxu1 %v1391_v12  ;;  %v1429_v45 = vld [vmem:[%s1759_s26 + $0x90] ss:$12 sps:$4 sm:$0xff]   ;;  %v1434_v47 = vld [vmem:[%s1759_s26 + $0xa8] ss:$12 sps:$4 sm:$0xff]  }
  0x6c   : > { %1273 = vmatprep.subr.bf16.mxu1 %v1394_v14 }
  0x6d   : > { %1194 = vmatpush3.bf16.msra.mxu0 %v1392_v13 }
  0x6e   : > { %1195 = vmatprep.subr.bf16.mxu0 %v1393_v15 }
  0x6f   : > { %1274 = vmatpush3.bf16.msra.mxu1 %v1394_v14 }
  0x70   : > { %1275 = vmatprep.subr.bf16.mxu1 %v1397_v17 }
  0x71   : > { %1196 = vmatpush3.bf16.msra.mxu0 %v1395_v16 }
  0x72   : > { %1197 = vmatprep.subr.bf16.mxu0 %v1396_v18 }
  0x73   : > { %1276 = vmatpush3.bf16.msra.mxu1 %v1397_v17 }
  0x74   : > { %1277 = vmatprep.subr.bf16.mxu1 %v1400_v21 }
  0x75   : > { %1198 = vmatpush3.bf16.msra.mxu0 %v1398_v19 }
  0x76   : > { %1199 = vmatprep.subr.bf16.mxu0 %v1399_v20 }
  0x77   : > { %1278 = vmatpush3.bf16.msra.mxu1 %v1400_v21 }
  0x78   : > { %1279 = vmatprep.subr.bf16.mxu1 %v1405_v25 }
  0x79   : > { %1200 = vmatpush3.bf16.msra.mxu0 %v1401_v23 }
  0x7b   : > { %1280 = vmatpush3.bf16.msra.mxu1 %v1405_v25 }
  0x7c   : > { %652 = vmatmul.mubr.bf16.vlgmr.msra.gmra.mrb[0].mxu0 %v1402_v26 }
  0x7d   : > { %659 = vmatprep.mubr.bf16.mxu0 %v1408_v27 }
  0x7e   : > { %1282 = vmatmul.mubr.bf16.vlgmr.msra.gmra.mrb[0].mxu1 %v1407_v28 }
  0x7f   : > { %1285 = vmatprep.mubr.bf16.mxu1 %v1414_v29 }
  0x84   : > { %660 = vmatmul.mubr.bf16.gmra.mrb[4].mxu0 %v1410_v30 }
  0x85   : > { %667 = vmatprep.mubr.bf16.mxu0 %v1411_v31 }
  0x86   : > { %1286 = vmatmul.mubr.bf16.gmra.mrb[4].mxu1 %v1415_v32 }
  0x87   : > { %1289 = vmatprep.mubr.bf16.mxu1 %v1422_v33 }
  0x8c   : > { %668 = vmatmul.mubr.bf16.gmra.mrb[8].mxu0 %v1413_v34 }
  0x8d   : > { %675 = vmatprep.mubr.bf16.mxu0 %v1416_v35 }
  0x8e   : > { %1290 = vmatmul.mubr.bf16.gmra.mrb[8].mxu1 %v1423_v36 }
  0x8f   : > { %1293 = vmatprep.mubr.bf16.mxu1 %v1430_v37 }
  0x94   : > { %676 = vmatmul.mubr.bf16.gmra.mrb[12].mxu0 %v1418_v38 }
  0x95   : > { %683 = vmatprep.mubr.bf16.mxu0 %v1419_v39 }
  0x96   : > { %1294 = vmatmul.mubr.bf16.gmra.mrb[12].mxu1 %v1431_v40 }
  0x9c   : > { %684 = vmatmul.mubr.bf16.gmra.mrb[16].mxu0 %v1421_v41 }
  0x9d   : > { %691 = vmatprep.mubr.bf16.mxu0 %v1424_v42 }
  0xa4   : > { %692 = vmatmul.mubr.bf16.gmra.mrb[20].mxu0 %v1426_v43 }
  0xa5   : > { %699 = vmatprep.mubr.bf16.mxu0 %v1427_v44 }
  0xac   : > { %700 = vmatmul.mubr.bf16.gmra.mrb[24].mxu0 %v1429_v45 }
  0xad   : > { %707 = vmatprep.mubr.bf16.mxu0 %v1432_v46 }
  0xb4   : > { %708 = vmatmul.mubr.bf16.gmra.mrb[28].mxu0 %v1434_v47 }
 0x14f   : > { %v1201_v48 = vpop.f32.mrb[0].mxu0 }
 0x150   : > { %v1202_v49 = vpop.f32.mrb[1].mxu0 }
 0x151   : > { %v1203_v51 = vadd.f32 %v1202_v49, %v1201_v48  ;;  %v1204_v52 = vpop.f32.mrb[2].mxu0  ;;  %v1283_v54 = vpop.f32.mrb[0].mxu1 }
 0x152   : > { %v1205_v53 = vpop.f32.mrb[3].mxu0  ;;  %v750_v57 = vpop.f32.mrb[1].mxu1 }
 0x153   : > { %v1206_v55 = vadd.f32 %v1205_v53, %v1204_v52  ;;  %v654_v56 = vadd.f32 %v1203_v51, %v1796_v50  ;;  %v1284_v58 = vpop.f32.mrb[2].mxu1 }
 0x154   : > { %v753_v61 = vpop.f32.mrb[3].mxu1 }
 0x155   : > { %v751_v59 = vadd.f32 %v750_v57, %v654_v56  ;;  %v657_v60 = vadd.f32 %v1206_v55, %v1796_v50 }
 0x157   : > { %v754_v62 = vadd.f32 %v753_v61, %v657_v60  ;;  %v1207_v63 = vpop.f32.mrb[4].mxu0  ;;  %v813_v1 = vmax.f32 %v751_v59, 0.0 }
 0x158   : > { %v1208_v0 = vpop.f32.mrb[5].mxu0 }
 0x159   : > { %v814_v2 = vmax.f32 %v754_v62, 0.0  ;;  %v1209_v3 = vadd.f32 %v1208_v0, %v1207_v63  ;;  %v1210_v4 = vpop.f32.mrb[6].mxu0  ;;  %v1287_v6 = vpop.f32.mrb[4].mxu1 }
 0x15a   : > { %v1211_v5 = vpop.f32.mrb[7].mxu0  ;;  %v766_v10 = vpop.f32.mrb[5].mxu1 }
 0x15b   : > { %v1141_v7 = vpack.c.bf16 %v814_v2, %v813_v1  ;;  %v662_v8 = vadd.f32 %v1209_v3, %v1796_v50  ;;  %v1212_v9 = vadd.f32 %v1211_v5, %v1210_v4  ;;  %v1288_v11 = vpop.f32.mrb[6].mxu1 }
 0x15c   : > { %v769_v14 = vpop.f32.mrb[7].mxu1 }
 0x15d   : > { %1142 = vst [vmem:[%s1802_s7] sm:$0xff] %v1141_v7   ;;  %v759_v12 = vadd.f32 %v1283_v54, %v662_v8  ;;  %v665_v13 = vadd.f32 %v1212_v9, %v1796_v50 }
 0x15f   : > { %v762_v15 = vadd.f32 %v1284_v58, %v665_v13  ;;  %v1213_v16 = vpop.f32.mrb[8].mxu0  ;;  %v815_v18 = vmax.f32 %v759_v12, 0.0 }
 0x160   : > { %v1214_v17 = vpop.f32.mrb[9].mxu0 }
 0x161   : > { %v816_v19 = vmax.f32 %v762_v15, 0.0  ;;  %v1215_v20 = vadd.f32 %v1214_v17, %v1213_v16  ;;  %v1216_v21 = vpop.f32.mrb[10].mxu0  ;;  %v1291_v23 = vpop.f32.mrb[8].mxu1 }
 0x162   : > { %v1217_v22 = vpop.f32.mrb[11].mxu0  ;;  %v782_v27 = vpop.f32.mrb[9].mxu1 }
 0x163   : > { %v1146_v24 = vpack.c.bf16 %v816_v19, %v815_v18  ;;  %v1218_v25 = vadd.f32 %v1217_v22, %v1216_v21  ;;  %v670_v26 = vadd.f32 %v1215_v20, %v1796_v50  ;;  %v1292_v28 = vpop.f32.mrb[10].mxu1 }
 0x164   : > { %v785_v31 = vpop.f32.mrb[11].mxu1 }
 0x165   : > { %1178 = vst [vmem:[%s1802_s7 + $0x8] sm:$0xff] %v1146_v24   ;;  %v767_v29 = vadd.f32 %v766_v10, %v670_v26  ;;  %v673_v30 = vadd.f32 %v1218_v25, %v1796_v50 }
 0x167   : > { %v770_v32 = vadd.f32 %v769_v14, %v673_v30  ;;  %v1219_v33 = vpop.f32.mrb[12].mxu0  ;;  %v817_v35 = vmax.f32 %v767_v29, 0.0 }
 0x168   : > { %v1220_v34 = vpop.f32.mrb[13].mxu0 }
 0x169   : > { %v818_v36 = vmax.f32 %v770_v32, 0.0  ;;  %v1221_v37 = vadd.f32 %v1220_v34, %v1219_v33  ;;  %v1222_v38 = vpop.f32.mrb[14].mxu0  ;;  %v1809_v40 = vpop.f32.mrb[12].mxu1 }
 0x16a   : > { %v1223_v39 = vpop.f32.mrb[15].mxu0  ;;  %v798_v44 = vpop.f32.mrb[13].mxu1 }
 0x16b   : > { %v1151_v41 = vpack.c.bf16 %v818_v36, %v817_v35  ;;  %v678_v42 = vadd.f32 %v1221_v37, %v1796_v50  ;;  %v1224_v43 = vadd.f32 %v1223_v39, %v1222_v38  ;;  %v1296_v45 = vpop.f32.mrb[14].mxu1 }
 0x16c   : > { %v801_v48 = vpop.f32.mrb[15].mxu1 }
 0x16d   : > { %1179 = vst [vmem:[%s1802_s7 + $0x10] sm:$0xff] %v1151_v41   ;;  %v775_v46 = vadd.f32 %v1287_v6, %v678_v42  ;;  %v681_v47 = vadd.f32 %v1224_v43, %v1796_v50 }
 0x16f   : > { %v778_v49 = vadd.f32 %v1288_v11, %v681_v47  ;;  %v1225_v51 = vpop.f32.mrb[16].mxu0  ;;  %v819_v53 = vmax.f32 %v775_v46, 0.0 }
 0x170   : > { %v1226_v52 = vpop.f32.mrb[17].mxu0 }
 0x171   : > { %v820_v54 = vmax.f32 %v778_v49, 0.0  ;;  %v1227_v55 = vadd.f32 %v1226_v52, %v1225_v51  ;;  %v1228_v56 = vpop.f32.mrb[18].mxu0 }
 0x172   : > { %v1229_v57 = vpop.f32.mrb[19].mxu0 }
 0x173   : > { %v1156_v58 = vpack.c.bf16 %v820_v54, %v819_v53  ;;  %v1230_v59 = vadd.f32 %v1229_v57, %v1228_v56  ;;  %v686_v60 = vadd.f32 %v1227_v55, %v1796_v50 }
 0x175   : > { %1180 = vst [vmem:[%s1802_s7 + $0x18] sm:$0xff] %v1156_v58   ;;  %v783_v61 = vadd.f32 %v782_v27, %v686_v60  ;;  %v689_v62 = vadd.f32 %v1230_v59, %v1796_v50 }
 0x177   : > { %v786_v63 = vadd.f32 %v785_v31, %v689_v62  ;;  %v1231_v0 = vpop.f32.mrb[20].mxu0  ;;  %v821_v2 = vmax.f32 %v783_v61, 0.0 }
 0x178   : > { %v1232_v1 = vpop.f32.mrb[21].mxu0 }
 0x179   : > { %v822_v3 = vmax.f32 %v786_v63, 0.0  ;;  %v1233_v4 = vadd.f32 %v1232_v1, %v1231_v0  ;;  %v1234_v5 = vpop.f32.mrb[22].mxu0 }
 0x17a   : > { %v1235_v6 = vpop.f32.mrb[23].mxu0 }
 0x17b   : > { %v1161_v7 = vpack.c.bf16 %v822_v3, %v821_v2  ;;  %v694_v8 = vadd.f32 %v1233_v4, %v1796_v50  ;;  %v1236_v9 = vadd.f32 %v1235_v6, %v1234_v5 }
 0x17d   : > { %1181 = vst [vmem:[%s1802_s7 + $0x20] sm:$0xff] %v1161_v7   ;;  %v791_v10 = vadd.f32 %v1291_v23, %v694_v8  ;;  %v697_v11 = vadd.f32 %v1236_v9, %v1796_v50 }
 0x17f   : > { %v794_v12 = vadd.f32 %v1292_v28, %v697_v11  ;;  %v1237_v13 = vpop.f32.mrb[24].mxu0  ;;  %v823_v15 = vmax.f32 %v791_v10, 0.0 }
 0x180   : > { %v1238_v14 = vpop.f32.mrb[25].mxu0 }
 0x181   : > { %v824_v16 = vmax.f32 %v794_v12, 0.0  ;;  %v1239_v17 = vadd.f32 %v1238_v14, %v1237_v13  ;;  %v1240_v18 = vpop.f32.mrb[26].mxu0 }
 0x182   : > { %v1241_v19 = vpop.f32.mrb[27].mxu0 }
 0x183   : > { %v1166_v20 = vpack.c.bf16 %v824_v16, %v823_v15  ;;  %v1242_v21 = vadd.f32 %v1241_v19, %v1240_v18  ;;  %v702_v22 = vadd.f32 %v1239_v17, %v1796_v50 }
 0x185   : > { %1182 = vst [vmem:[%s1802_s7 + $0x28] sm:$0xff] %v1166_v20   ;;  %v799_v24 = vadd.f32 %v798_v44, %v702_v22  ;;  %v705_v23 = vadd.f32 %v1242_v21, %v1796_v50 }
 0x187   : > { %v802_v25 = vadd.f32 %v801_v48, %v705_v23  ;;  %v1243_v26 = vpop.f32.mrb[28].mxu0  ;;  %v825_v28 = vmax.f32 %v799_v24, 0.0 }
 0x188   : > { %v1244_v27 = vpop.f32.mrb[29].mxu0 }
 0x189   : > { %v826_v29 = vmax.f32 %v802_v25, 0.0  ;;  %v1245_v30 = vadd.f32 %v1244_v27, %v1243_v26  ;;  %v1246_v31 = vpop.f32.mrb[30].mxu0 }
 0x18a   : > { %v1247_v32 = vpop.f32.mrb[31].mxu0 }
 0x18b   : > { %v1171_v33 = vpack.c.bf16 %v826_v29, %v825_v28  ;;  %v710_v34 = vadd.f32 %v1245_v30, %v1796_v50  ;;  %v1248_v35 = vadd.f32 %v1247_v32, %v1246_v31 }
 0x18d   : > { %1183 = vst [vmem:[%s1802_s7 + $0x30] sm:$0xff] %v1171_v33   ;;  %v807_v36 = vadd.f32 %v1809_v40, %v710_v34  ;;  %v713_v37 = vadd.f32 %v1248_v35, %v1796_v50 }
 0x18f   : > { %v810_v38 = vadd.f32 %v1296_v45, %v713_v37  ;;  %v827_v39 = vmax.f32 %v807_v36, 0.0 }
 0x191   : > { %v828_v41 = vmax.f32 %v810_v38, 0.0 }
 0x193   : > { %v1176_v42 = vpack.c.bf16 %v828_v41, %v827_v39 }
 0x195   : > { %1184 = vst [vmem:[%s1802_s7 + $0x38] sm:$0xff] %v1176_v42  }
 0x196   : > { %1506 = shalt.err (!%p1503_p5)
}
 0x197   : > { %s1507_s30 = scalar_lea.hbm %s1834_s6, 1024  ;;  %s1511_s20 = scalar_lea.hbm %s1886_s3, 4096 }
 0x198   : > { %p1508_p9 = scmp.ne.s32.totalorder %s1834_s6, %s1507_s30  ;;  %p1512_p3 = scmp.lt.u32.totalorder %s1834_s6, %s1886_s3 }
 0x199   : > { %p1513_p7 = scmp.lt.u32.totalorder %s1511_s20, %s1507_s30  ;;  %p1515_p4 = scmp.lt.u32.totalorder %s1507_s30, %s1834_s6 }
 0x19a   : > { %p1509_p1 = pnand %p1508_p9, %p1701_p11 }
 0x19b   : > { %p1514_p10 = por %p1513_p7, %p1512_p3 }
 0x19c   : > { %p1510_p2 = pneg %p1509_p1 }
 0x19d   : > { %p1516_p6 = por %p1515_p4, %p1514_p10 }
 0x19f   : > { %p1517_p8 = pnand %p1516_p6, %p1510_p2 }
 0x1a1   : > { %1520 = shalt.err (!%p1517_p8)
}
 0x1a2   : > { %s1588_s7 = smov 64   ;;  %s1589_s10 = smov 4  }
 0x1a3   : > { %1306 = dma.vmem_to_hbm [thread:$0]  (%p1701_p11), %s1829_s8, 1024, %s1834_s6, %s910_s9, %s1588_s7, %s1588_s7, %s1589_s10  }
 0x1a4 PF: > { %p1323_p12 = scmp.ge.s32.totalorder %s1579_s17, 2  ;;  %s939_s11 = sand.u32 1, %s1559_s12  }
 0x1a5   : > { %p1903_p13 = scmp.ne.s32.totalorder %s1894_s23, 0  ;;  %s940_s27 = scalar_lea.sflag [#allocation4], %s939_s11 }
 0x1a7   : > { %p1317_p0 = pnand %p1323_p12, %p1903_p13 }
 0x1a9   : > { %1554 = dma.done.wait (!%p1317_p0), %s940_s27, 1024  }
 0x1aa   : > { %1556 = vsyncadd (!%p1317_p0), %s940_s27, 4294966272  ;;  %s20_s17 = sadd.s32 1, %s1579_s17   ;;  %s1904_s12 = smov %s1563_s13 }
 0x1ab   : > { %p17_p5 = scmp.ge.s32.totalorder %s20_s17, 6   ;;  %s1905_s13 = smov %s1567_s14 }
 0x1ac   : > { %s1906_s14 = smov %s1710_s5  ;;  %s1907_s15 = smov %s1575_s16 }
 0x1ad   : > { %s1908_s16 = smov %s1910_s28  ;;  %19 = sbr.rel (!%p17_p5) target bundleno = 7 (0x7), region = 85 }
 0x1b4   :  { %945 = vsyncpa [#allocation3], 1 }
 0x1b5   :  { %947 = vsyncpa [#allocation3 + $0x1], 1 }
 0x1b6   :  { %948 = vsyncpa [#allocation6], 1 }
 0x1b7   :  { %949 = vsyncpa [#allocation4], 1 }
 0x1b8   :  { %951 = vsyncpa [#allocation4 + $0x1], 1 }

</bundles_post_ra>
